<compile_context>
chip_gen: v7x
topology: tpu7x:2x2x1
jax: 0.10.0
libtpu: 0.0.40
codegen_flags: <defaults>
</compile_context>

<pallas_src>
import jax
import jax.numpy as jnp
from jax import lax
from jax.experimental import pallas as pl
from jax.experimental.pallas import tpu as pltpu


def mlp_kernel(x_ref, w1_ref, b1_ref, w2_ref, b2_ref, w3_ref, b3_ref, o_ref):
    # x_ref:  (tb, IN) f32   w1_ref: (IN, H) bf16   b1_ref: (1, H) f32
    # w2_ref: (H, H)  bf16   b2_ref: (1, H)  f32
    # w3_ref: (1, H)  bf16   b3_ref: (1,)    f32 (SMEM)
    # o_ref:  (1, tb) f32    lane-dense output row for this batch tile
    x_bf = x_ref[...].astype(jnp.bfloat16)

    # fc1 + ReLU: bf16 MXU matmul, f32 accumulation, f32 elementwise (v5e has no bf16 VPU).
    h1 = jnp.dot(x_bf, w1_ref[...], preferred_element_type=jnp.float32) + b1_ref[...]
    h1 = jnp.maximum(h1, 0.0)

    # fc2 + ReLU
    h2 = jnp.dot(h1.astype(jnp.bfloat16), w2_ref[...],
                 preferred_element_type=jnp.float32) + b2_ref[...]
    h2 = jnp.maximum(h2, 0.0)

    # fc3 (out_features = 1): contract hidden of the (1, H) bf16 weight row against hidden of h2,
    # producing the lane-dense (1, tb) row directly.
    logits = lax.dot_general(
        w3_ref[...], h2.astype(jnp.bfloat16),
        dimension_numbers=(((1,), (1,)), ((), ())),
        preferred_element_type=jnp.float32,
    )  # (1, tb)

    o_ref[...] = (logits + b3_ref[0]).astype(o_ref.dtype)


def _round_up(x, m):
    return ((x + m - 1) // m) * m


def _invariant_spec(shape):
    """Grid-invariant block: fetched once, single-buffered (halves resident weight VMEM)."""
    idx = lambda i: (0, 0)
    try:
        return pl.BlockSpec(shape, idx, pipeline_mode=pl.Buffered(1))
    except Exception:  # older jax without pipeline_mode / Buffered
        return pl.BlockSpec(shape, idx)


def mlp_forward(x, params, *, tb=None):
    """Fused MLP forward. x: [B, input_size] -> [B, 1]."""
    w1, b1, w2, b2, w3_row, b3 = params
    B, in_size = x.shape
    hidden = w1.shape[1]

    # bf16 matmul operands (pre-cast weights once); biases / activations / epilogue stay f32.
    w1_bf = w1.astype(jnp.bfloat16)
    w2_bf = w2.astype(jnp.bfloat16)
    w3_bf = w3_row.astype(jnp.bfloat16)
    b1 = b1.astype(jnp.float32)
    b2 = b2.astype(jnp.float32)
    b3 = b3.astype(jnp.float32)
    x = x.astype(jnp.float32)

    ALIGN = 256  # M-dim alignment for v6e/v7x 256-wide MXU (also fine on v5e's 128-wide MXU)

    if tb is None:
        # Per-batch-row VMEM bytes: double-buffered f32 x tile, f32 h1/h2 (+ bf16 casts), out row.
        per_row = 2 * 4 * in_size + 2 * (4 + 2) * hidden + 2 * 4
        # Keep streamed/activation VMEM under ~24 MiB: leaves room for resident weights +
        # Mosaic scratch even on v7x's 64 MiB; bigger tiles amortize ~0.35us per-grid-step
        # overhead for small hidden sizes where the kernel is overhead-bound.
        tb_cap = max(ALIGN, min(2048, ((24 << 20) // max(per_row, 1)) // ALIGN * ALIGN))
        b_al = _round_up(B, ALIGN)
        if B > 256:
            # At least 2 grid steps so the "parallel" batch axis can split across v7x's 2 TCs.
            tb = min(tb_cap, _round_up(pl.cdiv(b_al, 2), ALIGN))
        else:
            tb = min(tb_cap, b_al)  # tiny batch: one fat tile

    b_pad = _round_up(B, tb)
    if b_pad != B:
        x = jnp.pad(x, ((0, b_pad - B), (0, 0)))
    grid = (b_pad // tb,)

    # Advisory cost estimate (bf16 weights, f32 x/out).
    flops = 2 * b_pad * (in_size * hidden + hidden * hidden + hidden)
    bytes_accessed = (4 * b_pad * in_size                                   # x (f32)
                      + 2 * (in_size * hidden + hidden * hidden + hidden)   # W1/W2/W3 (bf16)
                      + 4 * (2 * hidden + 1)                                # b1/b2/b3 (f32)
                      + 4 * b_pad)                                          # out (f32)

    # VMEM budget: single-buffered bf16 weights + f32 biases, double-buffered x/out tiles,
    # f32 + bf16 activation copies, plus headroom for Mosaic internal scratch.
    weight_bytes = 2 * (in_size * hidden + hidden * hidden + hidden) + 4 * (2 * hidden + 8)
    stream_bytes = tb * (2 * 4 * in_size + 2 * (4 + 2) * hidden + 2 * 4)
    vmem_need = weight_bytes + stream_bytes + (4 << 20)
    try:
        vmem_cap = int(pltpu.get_tpu_info().vmem_capacity_bytes)
    except Exception:
        vmem_cap = 64 << 20  # conservative fallback (v7x per-core VMEM)
    vmem_limit = int(max(16 << 20, min(vmem_cap - (8 << 20), max(32 << 20, vmem_need))))

    out_row = pl.pallas_call(
        mlp_kernel,
        out_shape=jax.ShapeDtypeStruct((1, b_pad), jnp.float32),
        grid_spec=pltpu.PrefetchScalarGridSpec(
            num_scalar_prefetch=0,
            grid=grid,
            in_specs=[
                pl.BlockSpec((tb, in_size), lambda i: (i, 0)),        # x batch tile (streamed)
                _invariant_spec((in_size, hidden)),                    # W1 bf16 (resident, 1-buf)
                _invariant_spec((1, hidden)),                          # b1 f32
                _invariant_spec((hidden, hidden)),                     # W2 bf16 (resident, 1-buf)
                _invariant_spec((1, hidden)),                          # b2 f32
                _invariant_spec((1, hidden)),                          # W3 row bf16
                pl.BlockSpec(memory_space=pltpu.MemorySpace.SMEM),     # b3 scalar in SMEM
            ],
            out_specs=pl.BlockSpec((1, tb), lambda i: (0, i)),         # lane-dense output slab
        ),
        compiler_params=pltpu.CompilerParams(
            dimension_semantics=("parallel",),
            vmem_limit_bytes=vmem_limit,
        ),
        cost_estimate=pl.CostEstimate(
            flops=flops, transcendentals=0, bytes_accessed=bytes_accessed),
    )(x, w1_bf, b1, w2_bf, b2, w3_bf, b3)

    # (1, b_pad) lane-dense slab -> [B, 1] (drop batch padding).
    return out_row.reshape(-1)[:B].reshape(B, 1)


def init_params(key, input_size, hidden_size):
    """Deterministic synthetic parameters (PyTorch-style uniform fan-in init)."""
    k1, k2, k3, k4, k5, k6 = jax.random.split(key, 6)

    def uni(k, shape, fan_in):
        bound = 1.0 / jnp.sqrt(jnp.float32(fan_in))
        return jax.random.uniform(k, shape, jnp.float32, -bound, bound)

    w1 = uni(k1, (input_size, hidden_size), input_size)
    b1 = uni(k2, (1, hidden_size), input_size)
    w2 = uni(k3, (hidden_size, hidden_size), hidden_size)
    b2 = uni(k4, (1, hidden_size), hidden_size)
    w3 = uni(k5, (1, hidden_size), hidden_size)   # PyTorch fc3.weight layout: (out=1, in=hidden)
    b3 = uni(k6, (1,), hidden_size)
    return (w1, b1, w2, b2, w3, b3)


def mlp_reference_f32(x, params):
    w1, b1, w2, b2, w3_row, b3 = params
    h1 = jnp.maximum(x @ w1 + b1, 0.0)
    h2 = jnp.maximum(h1 @ w2 + b2, 0.0)
    return h2 @ w3_row.T + b3


def mlp_reference_bf16(x, params):
    """Reference mimicking the kernel's bf16-matmul / f32-accumulate numerics."""
    w1, b1, w2, b2, w3_row, b3 = params
    bf = jnp.bfloat16
    h1 = jnp.dot(x.astype(bf), w1.astype(bf), preferred_element_type=jnp.float32) + b1
    h1 = jnp.maximum(h1, 0.0)
    h2 = jnp.dot(h1.astype(bf), w2.astype(bf), preferred_element_type=jnp.float32) + b2
    h2 = jnp.maximum(h2, 0.0)
    return jnp.dot(h2.astype(bf), w3_row.astype(bf).T,
                   preferred_element_type=jnp.float32) + b3


if __name__ == "__main__":
    key = jax.random.PRNGKey(0)
    k_x, k_p = jax.random.split(key)

    batch = 8
    input_size = 32
    hidden_size = 32

    x = jax.random.normal(k_x, (batch, input_size), jnp.float32)
    params = init_params(k_p, input_size, hidden_size)

    out = mlp_forward(x, params)
    out = jax.block_until_ready(out)
    assert out.shape == (batch, 1)

    # Tight check vs a reference with matching bf16-matmul numerics.
    ref_bf16 = mlp_reference_bf16(x, params)
    assert jnp.allclose(out, ref_bf16, atol=1e-3, rtol=1e-3), "mismatch vs bf16 reference"

    # Loose sanity check vs the full-f32 PyTorch-equivalent reference (bf16 matmul rounding).
    ref_f32 = mlp_reference_f32(x, params)
    assert jnp.allclose(out, ref_f32, atol=5e-2, rtol=5e-2), "mismatch vs f32 reference"

    print("KERNEL_OK")
</pallas_src>

<mosaic_0001>
module attributes {stable_mosaic.version = 11 : i64} {
  func.func @mlp_kernel(%arg0: i32, %arg1: memref<256x32xf32, #tpu.memory_space<vmem>>, %arg2: memref<32x32xbf16, #tpu.memory_space<vmem>>, %arg3: memref<1x32xf32, #tpu.memory_space<vmem>>, %arg4: memref<32x32xbf16, #tpu.memory_space<vmem>>, %arg5: memref<1x32xf32, #tpu.memory_space<vmem>>, %arg6: memref<1x32xbf16, #tpu.memory_space<vmem>>, %arg7: memref<1xf32, #tpu.memory_space<smem>>, %arg8: memref<1x256xf32, #tpu.memory_space<vmem>>) attributes {dimension_semantics = [#tpu.dimension_semantics<parallel>], iteration_bounds = array<i64: 1>, scalar_prefetch = 0 : i64, scratch_operands = 0 : i64, tpu.core_type = #tpu.core_type<tc>, window_params = [{transform_indices = @transform_0, window_bounds = array<i64: 256, 32>}, {pipeline_mode = #tpu.pipeline_mode<synchronous>, transform_indices = @transform_1, window_bounds = array<i64: 32, 32>}, {pipeline_mode = #tpu.pipeline_mode<synchronous>, transform_indices = @transform_2, window_bounds = array<i64: 1, 32>}, {pipeline_mode = #tpu.pipeline_mode<synchronous>, transform_indices = @transform_3, window_bounds = array<i64: 32, 32>}, {pipeline_mode = #tpu.pipeline_mode<synchronous>, transform_indices = @transform_4, window_bounds = array<i64: 1, 32>}, {pipeline_mode = #tpu.pipeline_mode<synchronous>, transform_indices = @transform_5, window_bounds = array<i64: 1, 32>}, {transform_indices = @transform_6, window_bounds = array<i64: 1>}, {transform_indices = @transform_7, window_bounds = array<i64: 1, 256>}]} {
    %c0 = arith.constant 0 : index
    %c0_0 = arith.constant 0 : index
    %0 = vector.load %arg1[%c0, %c0_0] : memref<256x32xf32, #tpu.memory_space<vmem>>, vector<256x32xf32>
    %1 = arith.truncf %0 : vector<256x32xf32> to vector<256x32xbf16>
    %c0_1 = arith.constant 0 : index
    %c0_2 = arith.constant 0 : index
    %2 = vector.load %arg2[%c0_1, %c0_2] : memref<32x32xbf16, #tpu.memory_space<vmem>>, vector<32x32xbf16>
    %cst = arith.constant dense<0.000000e+00> : vector<256x32xf32>
    %3 = tpu.matmul %1, %2, %cst {dimension_numbers = #tpu.dot_dimension_numbers<[1], [0], [0], [1], [0, 0, 1, 1], [], []>} : vector<256x32xbf16>, vector<32x32xbf16>, vector<256x32xf32> -> vector<256x32xf32>
    %c0_3 = arith.constant 0 : index
    %c0_4 = arith.constant 0 : index
    %4 = vector.load %arg3[%c0_3, %c0_4] : memref<1x32xf32, #tpu.memory_space<vmem>>, vector<1x32xf32>
    %5 = vector.broadcast %4 : vector<1x32xf32> to vector<256x32xf32>
    %6 = arith.addf %3, %5 : vector<256x32xf32>
    %cst_5 = arith.constant 0.000000e+00 : f32
    %7 = vector.broadcast %cst_5 : f32 to vector<256x32xf32>
    %8 = arith.maximumf %6, %7 : vector<256x32xf32>
    %9 = arith.truncf %8 : vector<256x32xf32> to vector<256x32xbf16>
    %c0_6 = arith.constant 0 : index
    %c0_7 = arith.constant 0 : index
    %10 = vector.load %arg4[%c0_6, %c0_7] : memref<32x32xbf16, #tpu.memory_space<vmem>>, vector<32x32xbf16>
    %cst_8 = arith.constant dense<0.000000e+00> : vector<256x32xf32>
    %11 = tpu.matmul %9, %10, %cst_8 {dimension_numbers = #tpu.dot_dimension_numbers<[1], [0], [0], [1], [0, 0, 1, 1], [], []>} : vector<256x32xbf16>, vector<32x32xbf16>, vector<256x32xf32> -> vector<256x32xf32>
    %c0_9 = arith.constant 0 : index
    %c0_10 = arith.constant 0 : index
    %12 = vector.load %arg5[%c0_9, %c0_10] : memref<1x32xf32, #tpu.memory_space<vmem>>, vector<1x32xf32>
    %13 = vector.broadcast %12 : vector<1x32xf32> to vector<256x32xf32>
    %14 = arith.addf %11, %13 : vector<256x32xf32>
    %cst_11 = arith.constant 0.000000e+00 : f32
    %15 = vector.broadcast %cst_11 : f32 to vector<256x32xf32>
    %16 = arith.maximumf %14, %15 : vector<256x32xf32>
    %c0_12 = arith.constant 0 : index
    %c0_13 = arith.constant 0 : index
    %17 = vector.load %arg6[%c0_12, %c0_13] : memref<1x32xbf16, #tpu.memory_space<vmem>>, vector<1x32xbf16>
    %18 = arith.truncf %16 : vector<256x32xf32> to vector<256x32xbf16>
    %cst_14 = arith.constant dense<0.000000e+00> : vector<1x256xf32>
    %19 = tpu.matmul %17, %18, %cst_14 {dimension_numbers = #tpu.dot_dimension_numbers<[1], [1], [0], [0], [0, 0, 1, 0], [], []>} : vector<1x32xbf16>, vector<256x32xbf16>, vector<1x256xf32> -> vector<1x256xf32>
    %c0_15 = arith.constant 0 : index
    %20 = memref.load %arg7[%c0_15] : memref<1xf32, #tpu.memory_space<smem>>
    %21 = vector.broadcast %20 : f32 to vector<1x256xf32>
    %22 = arith.addf %19, %21 : vector<1x256xf32>
    %c0_16 = arith.constant 0 : index
    %c0_17 = arith.constant 0 : index
    %23 = vector.load %arg8[%c0_16, %c0_17] : memref<1x256xf32, #tpu.memory_space<vmem>>, vector<1x256xf32>
    tpu.vector_store %arg8[%c0_16, %c0_17], %22 {strides = array<i32>} : memref<1x256xf32, #tpu.memory_space<vmem>>, vector<1x256xf32>,
    return
  }
  func.func @transform_0(%arg0: i32) -> (i32, i32) {
    %c0_i32 = arith.constant 0 : i32
    %c0_i32_0 = arith.constant 0 : i32
    return %arg0, %c0_i32 : i32, i32
  }
  func.func @transform_1(%arg0: i32) -> (i32, i32) {
    %c0_i32 = arith.constant 0 : i32
    %c0_i32_0 = arith.constant 0 : i32
    %c0_i32_1 = arith.constant 0 : i32
    return %c0_i32, %c0_i32_0 : i32, i32
  }
  func.func @transform_2(%arg0: i32) -> (i32, i32) {
    %c0_i32 = arith.constant 0 : i32
    %c0_i32_0 = arith.constant 0 : i32
    %c0_i32_1 = arith.constant 0 : i32
    return %c0_i32, %c0_i32_0 : i32, i32
  }
  func.func @transform_3(%arg0: i32) -> (i32, i32) {
    %c0_i32 = arith.constant 0 : i32
    %c0_i32_0 = arith.constant 0 : i32
    %c0_i32_1 = arith.constant 0 : i32
    return %c0_i32, %c0_i32_0 : i32, i32
  }
  func.func @transform_4(%arg0: i32) -> (i32, i32) {
    %c0_i32 = arith.constant 0 : i32
    %c0_i32_0 = arith.constant 0 : i32
    %c0_i32_1 = arith.constant 0 : i32
    return %c0_i32, %c0_i32_0 : i32, i32
  }
  func.func @transform_5(%arg0: i32) -> (i32, i32) {
    %c0_i32 = arith.constant 0 : i32
    %c0_i32_0 = arith.constant 0 : i32
    %c0_i32_1 = arith.constant 0 : i32
    return %c0_i32, %c0_i32_0 : i32, i32
  }
  func.func @transform_6(%arg0: i32) -> i32 {
    %c0_i32 = arith.constant 0 : i32
    %c0_i32_0 = arith.constant 0 : i32
    return %c0_i32 : i32
  }
  func.func @transform_7(%arg0: i32) -> (i32, i32) {
    %c0_i32 = arith.constant 0 : i32
    %c0_i32_0 = arith.constant 0 : i32
    return %c0_i32, %arg0 : i32, i32
  }
}

</mosaic_0001>

<bundles_post_ra>
// kernel: tpu_custom_call.1
= control target key start
LH: loop header
LB: loop body
LE: loop exit
PB: predicated region body
PF: predicated region fallthrough
CT: control target
= control target key end

     0   :  { %vm100_vm0 = vcmask 261120   ;;  %s1293_s0 = inlined_call_operand.vmem [shape: f32[256,32], index: 0, kind: input, shape index: {}]   ;;  %s1294_s1 = inlined_call_operand.vmem [shape: bf16[32,32], index: 1, kind: input, shape index: {}]   ;;  %s1295_s2 = inlined_call_operand.vmem [shape: f32[1,32], index: 2, kind: input, shape index: {}]   ;;  %s1296_s3 = inlined_call_operand.vmem [shape: bf16[32,32], index: 3, kind: input, shape index: {}]   ;;  %s1297_s4 = inlined_call_operand.vmem [shape: f32[1,32], index: 4, kind: input, shape index: {}]   ;;  %s1298_s5 = inlined_call_operand.vmem [shape: bf16[1,32], index: 5, kind: input, shape index: {}]   ;;  %s1299_s6 = inlined_call_operand.<no memory space> [shape: f32[1], index: 6, kind: input, shape index: {}]   ;;  %s1300_s7 = inlined_call_operand.hbm [shape: f32[1,256], index: 7, kind: output, shape index: {}]  }
   0x1   :  { %v945_v0 = vld [vmem:[%s1294_s1] sm:$0xff]   ;;  %v946_v1 = vld [vmem:[%s1294_s1 + $0x8] sm:$0xff]   ;;  %v31_v5 = vld [vmem:[%s1293_s0 + $0x10] sm:$0xff] }
   0x2   :  { %863 = vmatprep.subr.bf16.mxu0 %v945_v0  ;;  %v29_v2 = vld [vmem:[%s1293_s0] sm:$0xff]  ;;  %v30_v3 = vld [vmem:[%s1293_s0 + $0x8] sm:$0xff]  ;;  %v32_v6 = vld [vmem:[%s1293_s0 + $0x18] sm:$0xff] }
   0x3   :  { %864 = vmatpush3.bf16.msra.mxu0 %v945_v0  ;;  %v61_v4 = vpack.c.bf16 %v30_v3, %v29_v2  ;;  %v33_v7 = vld [vmem:[%s1293_s0 + $0x20] sm:$0xff]  ;;  %v34_v8 = vld [vmem:[%s1293_s0 + $0x28] sm:$0xff]  ;;  %v62_v9 = vpack.c.bf16 %v32_v6, %v31_v5  ;;  %v35_v11 = vld [vmem:[%s1293_s0 + $0x30] sm:$0xff] }
   0x4   :  { %865 = vmatprep.subr.bf16.mxu0 %v946_v1  ;;  %v63_v10 = vpack.c.bf16 %v34_v8, %v33_v7  ;;  %v36_v12 = vld [vmem:[%s1293_s0 + $0x38] sm:$0xff]  ;;  %v37_v13 = vld [vmem:[%s1293_s0 + $0x40] sm:$0xff]  ;;  %v38_v14 = vld [vmem:[%s1293_s0 + $0x48] sm:$0xff] }
   0x5   :  { %867 = vmatprep.mubr.msk.bf16.mxu0 %vm100_vm0, %v61_v4  ;;  %v64_v15 = vpack.c.bf16 %v36_v12, %v35_v11 }
   0x7   :  { %866 = vmatpush3.bf16.msra.mxu0 %v946_v1 }
   0xa   :  { %868 = vmatmul.mubr.msk.bf16.vlgmr.msra.gmra.mrb[0].mxu0 %vm100_vm0, %v62_v9 }
   0xb   :  { %871 = vmatprep.mubr.msk.bf16.mxu0 %vm100_vm0, %v63_v10 }
   0xc   :  { %13 = vsyncpa [#allocation4], 0  ;;  %v65_v16 = vpack.c.bf16 %v38_v14, %v37_v13  ;;  %v39_v17 = vld [vmem:[%s1293_s0 + $0x50] sm:$0xff]  ;;  %v40_v18 = vld [vmem:[%s1293_s0 + $0x58] sm:$0xff]  ;;  %s974_s27 = smov [#allocation3]  }
   0xd   :  { %v41_v19 = vld [vmem:[%s1293_s0 + $0x60] sm:$0xff]  ;;  %v42_v20 = vld [vmem:[%s1293_s0 + $0x68] sm:$0xff]  ;;  %v66_v21 = vpack.c.bf16 %v40_v18, %v39_v17  ;;  %v43_v23 = vld [vmem:[%s1293_s0 + $0x70] sm:$0xff]  ;;  %s762_s28 = sshll.u32 %s974_s27, 4  ;;  %s763_s28 = int_to_ptr.vmem [resolvable:$true] %s762_s28 }
   0xe   :  { %v67_v22 = vpack.c.bf16 %v42_v20, %v41_v19  ;;  %v44_v24 = vld [vmem:[%s1293_s0 + $0x78] sm:$0xff]  ;;  %v45_v25 = vld [vmem:[%s1293_s0 + $0x80] sm:$0xff]  ;;  %v46_v26 = vld [vmem:[%s1293_s0 + $0x88] sm:$0xff]  ;;  %s949_s29 = scalar_lea.vmem %s763_s28, 32  ;;  %p954_p1 = scmp.lt.s32.totalorder %s763_s28, %s763_s28 }
   0xf   :  { %v68_v27 = vpack.c.bf16 %v44_v24, %v43_v23  ;;  %v69_v28 = vpack.c.bf16 %v46_v26, %v45_v25  ;;  %v47_v29 = vld [vmem:[%s1293_s0 + $0x90] sm:$0xff]  ;;  %v48_v30 = vld [vmem:[%s1293_s0 + $0x98] sm:$0xff]  ;;  %v49_v31 = vld [vmem:[%s1293_s0 + $0xa0] sm:$0xff]  ;;  %p950_p0 = scmp.ne.s32.totalorder %s763_s28, %s949_s29  ;;  %p955_p2 = scmp.lt.s32.totalorder %s949_s29, %s949_s29 }
  0x10   :  { %v50_v32 = vld [vmem:[%s1293_s0 + $0xa8] sm:$0xff]  ;;  %v70_v33 = vpack.c.bf16 %v48_v30, %v47_v29  ;;  %v51_v35 = vld [vmem:[%s1293_s0 + $0xb0] sm:$0xff]  ;;  %v52_v36 = vld [vmem:[%s1293_s0 + $0xb8] sm:$0xff] }
  0x11   :  { %v71_v34 = vpack.c.bf16 %v50_v32, %v49_v31  ;;  %v53_v37 = vld [vmem:[%s1293_s0 + $0xc0] sm:$0xff]  ;;  %v54_v38 = vld [vmem:[%s1293_s0 + $0xc8] sm:$0xff]  ;;  %v72_v39 = vpack.c.bf16 %v52_v36, %v51_v35  ;;  %v55_v41 = vld [vmem:[%s1293_s0 + $0xd0] sm:$0xff]  ;;  %p956_p3 = por %p955_p2, %p954_p1 }
  0x12   :  { %872 = vmatmul.mubr.msk.bf16.gmra.mrb[4].mxu0 %vm100_vm0, %v64_v15  ;;  %v73_v40 = vpack.c.bf16 %v54_v38, %v53_v37  ;;  %v56_v42 = vld [vmem:[%s1293_s0 + $0xd8] sm:$0xff]  ;;  %v57_v43 = vld [vmem:[%s1293_s0 + $0xe0] sm:$0xff]  ;;  %v58_v44 = vld [vmem:[%s1293_s0 + $0xe8] sm:$0xff] }
  0x13   :  { %875 = vmatprep.mubr.msk.bf16.mxu0 %vm100_vm0, %v65_v16  ;;  %v74_v45 = vpack.c.bf16 %v56_v42, %v55_v41  ;;  %v75_v46 = vpack.c.bf16 %v58_v44, %v57_v43  ;;  %v59_v47 = vld [vmem:[%s1293_s0 + $0xf0] sm:$0xff]  ;;  %v60_v48 = vld [vmem:[%s1293_s0 + $0xf8] sm:$0xff]  ;;  %v947_v50 = vld [vmem:[%s1296_s3] sm:$0xff]   ;;  %p957_p4 = pnand %p956_p3, %p950_p0 }
  0x14   :  { %v76_v49 = vpack.c.bf16 %v60_v48, %v59_v47  ;;  %899 = vmatprep.subr.bf16.mxu1 %v947_v50  ;;  %v948_v51 = vld [vmem:[%s1296_s3 + $0x8] sm:$0xff]   ;;  %v1142_v52 = vld [vmem:[%s1295_s2] ss:$0 sm:$0xff] }
  0x15   :  { %900 = vmatpush3.bf16.msra.mxu1 %v947_v50 }
  0x16   :  { %901 = vmatprep.subr.bf16.mxu1 %v948_v51 }
  0x19   :  { %902 = vmatpush3.bf16.msra.mxu1 %v948_v51 }
  0x1a   :  { %876 = vmatmul.mubr.msk.bf16.gmra.mrb[8].mxu0 %vm100_vm0, %v66_v21 }
  0x1b   :  { %879 = vmatprep.mubr.msk.bf16.mxu0 %vm100_vm0, %v67_v22 }
  0x22   :  { %880 = vmatmul.mubr.msk.bf16.gmra.mrb[12].mxu0 %vm100_vm0, %v68_v27 }
  0x23   :  { %883 = vmatprep.mubr.msk.bf16.mxu0 %vm100_vm0, %v69_v28 }
  0x2a   :  { %884 = vmatmul.mubr.msk.bf16.gmra.mrb[16].mxu0 %vm100_vm0, %v70_v33 }
  0x2b   :  { %887 = vmatprep.mubr.msk.bf16.mxu0 %vm100_vm0, %v71_v34 }
  0x32   :  { %888 = vmatmul.mubr.msk.bf16.gmra.mrb[20].mxu0 %vm100_vm0, %v72_v39 }
  0x33   :  { %891 = vmatprep.mubr.msk.bf16.mxu0 %vm100_vm0, %v73_v40 }
  0x3a   :  { %892 = vmatmul.mubr.msk.bf16.gmra.mrb[24].mxu0 %vm100_vm0, %v74_v45 }
  0x3b   :  { %895 = vmatprep.mubr.msk.bf16.mxu0 %vm100_vm0, %v75_v46 }
  0x42   :  { %896 = vmatmul.mubr.msk.bf16.gmra.mrb[28].mxu0 %vm100_vm0, %v76_v49 }
  0xdd   :  { %v869_v53 = vpop.f32.mrb[0].mxu0 }
  0xde   :  { %v192_v54 = vadd.f32 %v869_v53, %v1142_v52  ;;  %v183_v55 = vpop.f32.mrb[1].mxu0 }
  0xdf   :  { %v184_v56 = vadd.f32 %v1142_v52, %v183_v55  ;;  %v870_v57 = vpop.f32.mrb[2].mxu0 }
  0xe0   :  { %v195_v58 = vadd.f32 %v870_v57, %v1142_v52  ;;  %v186_v59 = vpop.f32.mrb[3].mxu0  ;;  %v312_v61 = vmax.f32 %v192_v54, 0.0 }
  0xe1   :  { %v187_v60 = vadd.f32 %v1142_v52, %v186_v59  ;;  %v310_v63 = vmax.f32 %v184_v56, 0.0 }
  0xe2   :  { %v313_v62 = vmax.f32 %v195_v58, 0.0 }
  0xe3   :  { %v311_v0 = vmax.f32 %v187_v60, 0.0 }
  0xe4   :  { %v343_v1 = vpack.c.bf16 %v313_v62, %v312_v61 }
  0xe5   :  { %v873_v2 = vpop.f32.mrb[4].mxu0  ;;  %v342_v3 = vpack.c.bf16 %v311_v0, %v310_v63 }
  0xe6   :  { %v208_v4 = vadd.f32 %v873_v2, %v1142_v52  ;;  %v199_v5 = vpop.f32.mrb[5].mxu0 }
  0xe7   :  { %v200_v6 = vadd.f32 %v1142_v52, %v199_v5  ;;  %v874_v7 = vpop.f32.mrb[6].mxu0  ;;  %903 = vmatprep.mubr.msk.bf16.mxu1 %vm100_vm0, %v342_v3 }
  0xe8   :  { %v211_v8 = vadd.f32 %v874_v7, %v1142_v52  ;;  %v202_v9 = vpop.f32.mrb[7].mxu0  ;;  %904 = vmatmul.mubr.msk.bf16.vlgmr.msra.gmra.mrb[0].mxu1 %vm100_vm0, %v343_v1  ;;  %v316_v11 = vmax.f32 %v208_v4, 0.0 }
  0xe9   :  { %v203_v10 = vadd.f32 %v1142_v52, %v202_v9  ;;  %v314_v13 = vmax.f32 %v200_v6, 0.0 }
  0xea   :  { %v317_v12 = vmax.f32 %v211_v8, 0.0 }
  0xeb   :  { %v315_v14 = vmax.f32 %v203_v10, 0.0 }
  0xec   :  { %v345_v15 = vpack.c.bf16 %v317_v12, %v316_v11 }
  0xed   :  { %v344_v16 = vpack.c.bf16 %v315_v14, %v314_v13  ;;  %v877_v17 = vpop.f32.mrb[8].mxu0 }
  0xee   :  { %v224_v18 = vadd.f32 %v877_v17, %v1142_v52  ;;  %v215_v19 = vpop.f32.mrb[9].mxu0 }
  0xef   :  { %v216_v20 = vadd.f32 %v1142_v52, %v215_v19  ;;  %v878_v21 = vpop.f32.mrb[10].mxu0  ;;  %907 = vmatprep.mubr.msk.bf16.mxu1 %vm100_vm0, %v344_v16 }
  0xf0   :  { %v227_v22 = vadd.f32 %v878_v21, %v1142_v52  ;;  %v218_v23 = vpop.f32.mrb[11].mxu0  ;;  %908 = vmatmul.mubr.msk.bf16.gmra.mrb[4].mxu1 %vm100_vm0, %v345_v15  ;;  %v320_v25 = vmax.f32 %v224_v18, 0.0 }
  0xf1   :  { %v219_v24 = vadd.f32 %v1142_v52, %v218_v23  ;;  %v318_v27 = vmax.f32 %v216_v20, 0.0 }
  0xf2   :  { %v321_v26 = vmax.f32 %v227_v22, 0.0 }
  0xf3   :  { %v319_v28 = vmax.f32 %v219_v24, 0.0 }
  0xf4   :  { %v347_v29 = vpack.c.bf16 %v321_v26, %v320_v25 }
  0xf5   :  { %v346_v30 = vpack.c.bf16 %v319_v28, %v318_v27  ;;  %v881_v31 = vpop.f32.mrb[12].mxu0 }
  0xf6   :  { %v240_v32 = vadd.f32 %v881_v31, %v1142_v52  ;;  %v231_v33 = vpop.f32.mrb[13].mxu0 }
  0xf7   :  { %v232_v34 = vadd.f32 %v1142_v52, %v231_v33  ;;  %v882_v35 = vpop.f32.mrb[14].mxu0  ;;  %911 = vmatprep.mubr.msk.bf16.mxu1 %vm100_vm0, %v346_v30 }
  0xf8   :  { %v243_v36 = vadd.f32 %v882_v35, %v1142_v52  ;;  %v234_v37 = vpop.f32.mrb[15].mxu0  ;;  %912 = vmatmul.mubr.msk.bf16.gmra.mrb[8].mxu1 %vm100_vm0, %v347_v29  ;;  %v324_v39 = vmax.f32 %v240_v32, 0.0 }
  0xf9   :  { %v235_v38 = vadd.f32 %v1142_v52, %v234_v37  ;;  %v322_v41 = vmax.f32 %v232_v34, 0.0 }
  0xfa   :  { %v325_v40 = vmax.f32 %v243_v36, 0.0 }
  0xfb   :  { %v323_v42 = vmax.f32 %v235_v38, 0.0  ;;  %v1195_v38 = vld [vmem:[%s1298_s5] sm:$0x1] }
  0xfc   :  { %v349_v43 = vpack.c.bf16 %v325_v40, %v324_v39  ;;  %861 = vmatprep.mubr.msk.bf16.mxu0 %vm100_vm0, %v1195_v38 }
  0xfd   :  { %v348_v44 = vpack.c.bf16 %v323_v42, %v322_v41  ;;  %v885_v45 = vpop.f32.mrb[16].mxu0 }
  0xfe   :  { %v256_v46 = vadd.f32 %v885_v45, %v1142_v52  ;;  %v247_v47 = vpop.f32.mrb[17].mxu0 }
  0xff   :  { %v248_v48 = vadd.f32 %v1142_v52, %v247_v47  ;;  %v886_v49 = vpop.f32.mrb[18].mxu0  ;;  %915 = vmatprep.mubr.msk.bf16.mxu1 %vm100_vm0, %v348_v44 }
 0x100   :  { %v259_v50 = vadd.f32 %v886_v49, %v1142_v52  ;;  %v250_v51 = vpop.f32.mrb[19].mxu0  ;;  %916 = vmatmul.mubr.msk.bf16.gmra.mrb[12].mxu1 %vm100_vm0, %v349_v43  ;;  %v328_v54 = vmax.f32 %v256_v46, 0.0 }
 0x101   :  { %v251_v53 = vadd.f32 %v1142_v52, %v250_v51  ;;  %v326_v56 = vmax.f32 %v248_v48, 0.0 }
 0x102   :  { %v329_v55 = vmax.f32 %v259_v50, 0.0 }
 0x103   :  { %v327_v57 = vmax.f32 %v251_v53, 0.0 }
 0x104   :  { %v351_v58 = vpack.c.bf16 %v329_v55, %v328_v54 }
 0x105   :  { %v350_v59 = vpack.c.bf16 %v327_v57, %v326_v56  ;;  %v889_v60 = vpop.f32.mrb[20].mxu0 }
 0x106   :  { %v272_v61 = vadd.f32 %v889_v60, %v1142_v52  ;;  %v263_v62 = vpop.f32.mrb[21].mxu0 }
 0x107   :  { %v264_v63 = vadd.f32 %v1142_v52, %v263_v62  ;;  %919 = vmatprep.mubr.msk.bf16.mxu1 %vm100_vm0, %v350_v59  ;;  %v890_v0 = vpop.f32.mrb[22].mxu0 }
 0x108   :  { %v332_v1 = vmax.f32 %v272_v61, 0.0  ;;  %v275_v2 = vadd.f32 %v890_v0, %v1142_v52  ;;  %920 = vmatmul.mubr.msk.bf16.gmra.mrb[16].mxu1 %vm100_vm0, %v351_v58  ;;  %v266_v3 = vpop.f32.mrb[23].mxu0 }
 0x109   :  { %v330_v4 = vmax.f32 %v264_v63, 0.0  ;;  %v267_v5 = vadd.f32 %v1142_v52, %v266_v3 }
 0x10a   :  { %v333_v6 = vmax.f32 %v275_v2, 0.0 }
 0x10b   :  { %v331_v7 = vmax.f32 %v267_v5, 0.0 }
 0x10c   :  { %v353_v8 = vpack.c.bf16 %v333_v6, %v332_v1 }
 0x10d   :  { %v352_v9 = vpack.c.bf16 %v331_v7, %v330_v4  ;;  %v893_v10 = vpop.f32.mrb[24].mxu0 }
 0x10e   :  { %v288_v11 = vadd.f32 %v893_v10, %v1142_v52  ;;  %v279_v12 = vpop.f32.mrb[25].mxu0 }
 0x10f   :  { %923 = vmatprep.mubr.msk.bf16.mxu1 %vm100_vm0, %v352_v9  ;;  %v280_v13 = vadd.f32 %v1142_v52, %v279_v12  ;;  %v894_v14 = vpop.f32.mrb[26].mxu0 }
 0x110   :  { %924 = vmatmul.mubr.msk.bf16.gmra.mrb[20].mxu1 %vm100_vm0, %v353_v8  ;;  %v336_v15 = vmax.f32 %v288_v11, 0.0  ;;  %v291_v16 = vadd.f32 %v894_v14, %v1142_v52  ;;  %v282_v17 = vpop.f32.mrb[27].mxu0 }
 0x111   :  { %v334_v18 = vmax.f32 %v280_v13, 0.0  ;;  %v283_v19 = vadd.f32 %v1142_v52, %v282_v17 }
 0x112   :  { %v337_v20 = vmax.f32 %v291_v16, 0.0 }
 0x113   :  { %v335_v21 = vmax.f32 %v283_v19, 0.0 }
 0x114   :  { %v355_v22 = vpack.c.bf16 %v337_v20, %v336_v15 }
 0x115   :  { %v354_v23 = vpack.c.bf16 %v335_v21, %v334_v18  ;;  %v897_v24 = vpop.f32.mrb[28].mxu0 }
 0x116   :  { %v304_v25 = vadd.f32 %v897_v24, %v1142_v52  ;;  %v295_v26 = vpop.f32.mrb[29].mxu0 }
 0x117   :  { %927 = vmatprep.mubr.msk.bf16.mxu1 %vm100_vm0, %v354_v23  ;;  %v296_v27 = vadd.f32 %v1142_v52, %v295_v26  ;;  %v898_v28 = vpop.f32.mrb[30].mxu0 }
 0x118   :  { %928 = vmatmul.mubr.msk.bf16.gmra.mrb[24].mxu1 %vm100_vm0, %v355_v22  ;;  %v340_v29 = vmax.f32 %v304_v25, 0.0  ;;  %v307_v30 = vadd.f32 %v898_v28, %v1142_v52  ;;  %v298_v31 = vpop.f32.mrb[31].mxu0 }
 0x119   :  { %v338_v32 = vmax.f32 %v296_v27, 0.0  ;;  %v299_v33 = vadd.f32 %v1142_v52, %v298_v31  ;;  %v1202_v52 = vld [vmem:[%s1297_s4] ss:$0 sm:$0xff] }
 0x11a   :  { %v341_v34 = vmax.f32 %v307_v30, 0.0 }
 0x11b   :  { %v339_v35 = vmax.f32 %v299_v33, 0.0 }
 0x11c   :  { %v357_v36 = vpack.c.bf16 %v341_v34, %v340_v29 }
 0x11d   :  { %v356_v37 = vpack.c.bf16 %v339_v35, %v338_v32 }
 0x11f   :  { %931 = vmatprep.mubr.msk.bf16.mxu1 %vm100_vm0, %v356_v37 }
 0x120   :  { %932 = vmatmul.mubr.msk.bf16.gmra.mrb[28].mxu1 %vm100_vm0, %v357_v36 }
 0x1bb   :  { %v905_v39 = vpop.f32.mrb[0].mxu1 }
 0x1bc   :  { %v472_v40 = vadd.f32 %v905_v39, %v1202_v52  ;;  %v463_v41 = vpop.f32.mrb[1].mxu1 }
 0x1bd   :  { %v464_v42 = vadd.f32 %v1202_v52, %v463_v41  ;;  %v906_v43 = vpop.f32.mrb[2].mxu1 }
 0x1be   :  { %v475_v44 = vadd.f32 %v906_v43, %v1202_v52  ;;  %v466_v45 = vpop.f32.mrb[3].mxu1  ;;  %v592_v47 = vmax.f32 %v472_v40, 0.0 }
 0x1bf   :  { %v467_v46 = vadd.f32 %v1202_v52, %v466_v45  ;;  %v590_v49 = vmax.f32 %v464_v42, 0.0 }
 0x1c0   :  { %v593_v48 = vmax.f32 %v475_v44, 0.0 }
 0x1c1   :  { %v591_v50 = vmax.f32 %v467_v46, 0.0 }
 0x1c2   :  { %v1208_v51 = vpack.c.bf16 %v593_v48, %v592_v47 }
 0x1c3   :  { %v1210_v53 = vpack.c.bf16 %v591_v50, %v590_v49  ;;  %v909_v54 = vpop.f32.mrb[4].mxu1 }
 0x1c4   :  { %v488_v55 = vadd.f32 %v909_v54, %v1202_v52  ;;  %v479_v56 = vpop.f32.mrb[5].mxu1 }
 0x1c5   :  { %v480_v57 = vadd.f32 %v1202_v52, %v479_v56  ;;  %v910_v58 = vpop.f32.mrb[6].mxu1 }
 0x1c6   :  { %v491_v59 = vadd.f32 %v910_v58, %v1202_v52  ;;  %v482_v60 = vpop.f32.mrb[7].mxu1  ;;  %v596_v62 = vmax.f32 %v488_v55, 0.0  ;;  %v645_v55 = vsel %vm100_vm0, %v1210_v53, 0  ;;  %v648_v53 = vsel %vm100_vm0, %v1208_v51, 0 }
 0x1c7   :  { %v483_v61 = vadd.f32 %v1202_v52, %v482_v60  ;;  %v594_v0 = vmax.f32 %v480_v57, 0.0 }
 0x1c8   :  { %v597_v63 = vmax.f32 %v491_v59, 0.0 }
 0x1c9   :  { %v595_v1 = vmax.f32 %v483_v61, 0.0 }
 0x1ca   :  { %v1216_v2 = vpack.c.bf16 %v597_v63, %v596_v62 }
 0x1cb   :  { %v1218_v3 = vpack.c.bf16 %v595_v1, %v594_v0  ;;  %v913_v4 = vpop.f32.mrb[8].mxu1 }
 0x1cc   :  { %v504_v5 = vadd.f32 %v913_v4, %v1202_v52  ;;  %v495_v6 = vpop.f32.mrb[9].mxu1 }
 0x1cd   :  { %v496_v7 = vadd.f32 %v1202_v52, %v495_v6  ;;  %v914_v8 = vpop.f32.mrb[10].mxu1 }
 0x1ce   :  { %v507_v9 = vadd.f32 %v914_v8, %v1202_v52  ;;  %v498_v10 = vpop.f32.mrb[11].mxu1  ;;  %v600_v12 = vmax.f32 %v504_v5, 0.0 }
 0x1cf   :  { %v499_v11 = vadd.f32 %v1202_v52, %v498_v10  ;;  %v598_v14 = vmax.f32 %v496_v7, 0.0 }
 0x1d0   :  { %v601_v13 = vmax.f32 %v507_v9, 0.0 }
 0x1d1   :  { %v599_v15 = vmax.f32 %v499_v11, 0.0 }
 0x1d2   :  { %v1224_v16 = vpack.c.bf16 %v601_v13, %v600_v12 }
 0x1d3   :  { %v1226_v17 = vpack.c.bf16 %v599_v15, %v598_v14  ;;  %v917_v18 = vpop.f32.mrb[12].mxu1 }
 0x1d4   :  { %v520_v19 = vadd.f32 %v917_v18, %v1202_v52  ;;  %v511_v20 = vpop.f32.mrb[13].mxu1 }
 0x1d5   :  { %v512_v21 = vadd.f32 %v1202_v52, %v511_v20  ;;  %v918_v22 = vpop.f32.mrb[14].mxu1 }
 0x1d6   :  { %v523_v23 = vadd.f32 %v918_v22, %v1202_v52  ;;  %v514_v24 = vpop.f32.mrb[15].mxu1  ;;  %v604_v26 = vmax.f32 %v520_v19, 0.0 }
 0x1d7   :  { %v515_v25 = vadd.f32 %v1202_v52, %v514_v24  ;;  %v602_v28 = vmax.f32 %v512_v21, 0.0  ;;  %v651_v21 = vsel %vm100_vm0, %v1218_v3, 0  ;;  %v654_v3 = vsel %vm100_vm0, %v1216_v2, 0 }
 0x1d8   :  { %v605_v27 = vmax.f32 %v523_v23, 0.0 }
 0x1d9   :  { %v603_v29 = vmax.f32 %v515_v25, 0.0 }
 0x1da   :  { %v1232_v30 = vpack.c.bf16 %v605_v27, %v604_v26 }
 0x1db   :  { %v1234_v31 = vpack.c.bf16 %v603_v29, %v602_v28  ;;  %v921_v32 = vpop.f32.mrb[16].mxu1 }
 0x1dc   :  { %v536_v33 = vadd.f32 %v921_v32, %v1202_v52  ;;  %v527_v34 = vpop.f32.mrb[17].mxu1  ;;  %v666_v2 = vsel %vm100_vm0, %v1232_v30, 0 }
 0x1dd   :  { %v528_v35 = vadd.f32 %v1202_v52, %v527_v34  ;;  %v922_v36 = vpop.f32.mrb[18].mxu1 }
 0x1de   :  { %v539_v37 = vadd.f32 %v922_v36, %v1202_v52  ;;  %v530_v39 = vpop.f32.mrb[19].mxu1  ;;  %v608_v41 = vmax.f32 %v536_v33, 0.0  ;;  %v660_v36 = vsel %vm100_vm0, %v1224_v16, 0  ;;  %v640_v16 = vstv %s1299_s6 }
 0x1df   :  { %v531_v40 = vadd.f32 %v1202_v52, %v530_v39  ;;  %v606_v43 = vmax.f32 %v528_v35, 0.0  ;;  %v657_v35 = vsel %vm100_vm0, %v1226_v17, 0  ;;  %v973_v17 = vmov 1966171168  }
 0x1e0   :  { %v609_v42 = vmax.f32 %v539_v37, 0.0  ;;  %v737_v37 = vunpack.c.l.s4 %v973_v17  ;;  %v739_v39 = vlaneseq }
 0x1e1   :  { %v607_v44 = vmax.f32 %v531_v40, 0.0 }
 0x1e2   :  { %v632_v45 = vpack.c.bf16 %v609_v42, %v608_v41  ;;  %v738_v40 = vunpack.c.0.s8 %v737_v37  ;;  %v740_v41 = vshrl.u32 %v739_v39, 7  ;;  %vm753_vm1 = vcmp.lt.s32.totalorder %v739_v39, 256 }
 0x1e3   :  { %v631_v46 = vpack.c.bf16 %v607_v44, %v606_v43  ;;  %v925_v47 = vpop.f32.mrb[20].mxu1 }
 0x1e4   :  { %v552_v48 = vadd.f32 %v925_v47, %v1202_v52  ;;  %v543_v49 = vpop.f32.mrb[21].mxu1 }
 0x1e5   :  { %v544_v50 = vadd.f32 %v1202_v52, %v543_v49  ;;  %935 = vmatprep.subr.msk.bf16.mxu0 %vm100_vm0, %v631_v46  ;;  %v926_v54 = vpop.f32.mrb[22].mxu1 }
 0x1e6   :  { %v612_v56 = vmax.f32 %v552_v48, 0.0  ;;  %v555_v57 = vadd.f32 %v926_v54, %v1202_v52  ;;  %846 = vmatpush3.bf16.xpose.msra.mxu0 %v645_v55  ;;  %v546_v58 = vpop.f32.mrb[23].mxu1 }
 0x1e7   :  { %v610_v59 = vmax.f32 %v544_v50, 0.0  ;;  %v547_v60 = vadd.f32 %v1202_v52, %v546_v58  ;;  %936 = vmatprep.subr.msk.bf16.mxu0 %vm100_vm0, %v632_v45  ;;  %v741_v45 = vsub.s32 %v738_v40, %v740_v41 }
 0x1e8   :  { %v613_v61 = vmax.f32 %v555_v57, 0.0 }
 0x1e9   :  { %v611_v62 = vmax.f32 %v547_v60, 0.0 }
 0x1ea   :  { %v634_v63 = vpack.c.bf16 %v613_v61, %v612_v56 }
 0x1eb   :  { %v633_v0 = vpack.c.bf16 %v611_v62, %v610_v59  ;;  %v929_v1 = vpop.f32.mrb[24].mxu1 }
 0x1ec   :  { %v568_v4 = vadd.f32 %v929_v1, %v1202_v52  ;;  %v559_v5 = vpop.f32.mrb[25].mxu1 }
 0x1ed   :  { %v560_v6 = vadd.f32 %v1202_v52, %v559_v5  ;;  %v930_v7 = vpop.f32.mrb[26].mxu1 }
 0x1ee   :  { %848 = vmatpush3.bf16.xpose.msra.mxu0 %v648_v53  ;;  %v616_v8 = vmax.f32 %v568_v4, 0.0  ;;  %v571_v9 = vadd.f32 %v930_v7, %v1202_v52  ;;  %v562_v10 = vpop.f32.mrb[27].mxu1 }
 0x1ef   :  { %937 = vmatprep.subr.msk.bf16.mxu0 %vm100_vm0, %v633_v0  ;;  %v614_v11 = vmax.f32 %v560_v6, 0.0  ;;  %v563_v12 = vadd.f32 %v1202_v52, %v562_v10 }
 0x1f0   :  { %v617_v13 = vmax.f32 %v571_v9, 0.0 }
 0x1f1   :  { %v615_v14 = vmax.f32 %v563_v12, 0.0 }
 0x1f2   :  { %v636_v15 = vpack.c.bf16 %v617_v13, %v616_v8 }
 0x1f3   :  { %v635_v18 = vpack.c.bf16 %v615_v14, %v614_v11  ;;  %v933_v19 = vpop.f32.mrb[28].mxu1 }
 0x1f4   :  { %v584_v51 = vadd.f32 %v933_v19, %v1202_v52  ;;  %v575_v20 = vpop.f32.mrb[29].mxu1 }
 0x1f5   :  { %v576_v22 = vadd.f32 %v1202_v52, %v575_v20  ;;  %v934_v23 = vpop.f32.mrb[30].mxu1 }
 0x1f6   :  { %850 = vmatpush3.bf16.xpose.msra.mxu0 %v651_v21  ;;  %v620_v24 = vmax.f32 %v584_v51, 0.0  ;;  %v587_v25 = vadd.f32 %v934_v23, %v1202_v52  ;;  %v578_v26 = vpop.f32.mrb[31].mxu1 }
 0x1f7   :  { %938 = vmatprep.subr.msk.bf16.mxu0 %vm100_vm0, %v634_v63  ;;  %v618_v27 = vmax.f32 %v576_v22, 0.0  ;;  %v579_v28 = vadd.f32 %v1202_v52, %v578_v26  ;;  %v663_v52 = vsel %vm100_vm0, %v1234_v31, 0 }
 0x1f8   :  { %v621_v29 = vmax.f32 %v587_v25, 0.0 }
 0x1f9   :  { %v619_v32 = vmax.f32 %v579_v28, 0.0 }
 0x1fa   :  { %v638_v33 = vpack.c.bf16 %v621_v29, %v620_v24 }
 0x1fb   :  { %v637_v34 = vpack.c.bf16 %v619_v32, %v618_v27 }
 0x1fe   :  { %852 = vmatpush3.bf16.xpose.msra.mxu0 %v654_v3 }
 0x1ff   :  { %939 = vmatprep.subr.msk.bf16.mxu0 %vm100_vm0, %v635_v18 }
 0x206   :  { %854 = vmatpush3.bf16.xpose.msra.mxu0 %v657_v35 }
 0x207   :  { %940 = vmatprep.subr.msk.bf16.mxu0 %vm100_vm0, %v636_v15 }
 0x20e   :  { %856 = vmatpush3.bf16.xpose.msra.mxu0 %v660_v36 }
 0x20f   :  { %941 = vmatprep.subr.msk.bf16.mxu0 %vm100_vm0, %v637_v34 }
 0x216   :  { %858 = vmatpush3.bf16.xpose.msra.mxu0 %v663_v52 }
 0x217   :  { %942 = vmatprep.subr.msk.bf16.mxu0 %vm100_vm0, %v638_v33 }
 0x21e   :  { %860 = vmatpush3.bf16.xpose.msra.mxu0 %v666_v2 }
 0x225   :  { %862 = vmatmul.mubr.msk.bf16.vlgmr.msra.gmra.mrb[32].mxu0 %vm100_vm0, %v1195_v38 }
 0x2f8   :  { %v726_v31 = vpop.f32.mrb[32].mxu0 }
 0x2f9   :  { %v727_v42 = vadd.f32 %v726_v31, %v640_v16  ;;  %v728_v43 = vpop.f32.mrb[33].mxu0 }
 0x2fa   :  { %v729_v44 = vadd.f32 %v728_v43, %v640_v16  ;;  %v730_v46 = vpop.f32.mrb[34].mxu0 }
 0x2fb   :  { %v731_v30 = vpop.f32.mrb[35].mxu0 }
 0x2fc   :  { %v735_v47 = vcombine.low %v727_v42, %v729_v44 }
 0x2fe   :  { %v742_v38 = vrot.slane %v735_v47, %v741_v45 }
 0x300   :  { %v749_v48 = vrot.slane %v742_v38, %v741_v45 }
 0x302   :  { %755 = vst.msk [vmem:[#allocation3] sm:$0x3] %vm753_vm1, %v749_v48 }
 0x303   :  { %960 = shalt.err (!%p957_p4)
}
 0x304   :  { %s961_s8 = scalar_lea.hbm %s1300_s7, 32 }
 0x305   :  { %p962_p5 = scmp.ne.s32.totalorder %s1300_s7, %s961_s8  ;;  %p965_p6 = scmp.lt.u32.totalorder %s961_s8, %s1300_s7 }
 0x307   :  { %p967_p7 = pnand %p965_p6, %p962_p5 }
 0x309   :  { %970 = shalt.err (!%p967_p7)
}
 0x30a   :  { %765 = dma.vmem_to_hbm [thread:$0]  %s763_s28, 32, %s1300_s7, [#allocation4]  }
 0x30b   :  { %971 = dma.done.wait [#allocation4], 32  }
 0x30c   :  { %972 = vsyncadd [#allocation4], 4294967264 }
 0x30d   :  { %769 = vsyncpa [#allocation4], 1 }

</bundles_post_ra>
